<compile_context>
chip_gen: v7x
topology: tpu7x:2x2x1
jax: 0.10.0
libtpu: 0.0.40
codegen_flags: <defaults>
</compile_context>

<pallas_src>
import functools

import jax
import jax.numpy as jnp
from jax.experimental import pallas as pl
from jax.experimental.pallas import tpu as pltpu

BN_EPS = 1e-5
GIN_EPS = 0.0
LANE = 128


def _round_up(v, m):
    return (v + m - 1) // m * m


def _pad_to(a, shape):
    return jnp.pad(a, [(0, t - s) for s, t in zip(a.shape, shape)])


# --------------------------------------------------------------------------
# Fused kernel: all GINConv layers + head in one pallas_call.
#   per layer:  h = (A + (1+eps)I) @ x
#               z = relu(BN(h @ W1 + b1))
#               x = relu(z @ W2 + b2)
#   head:       out = sigmoid(relu(x @ Wl1 + bl1) @ Wl2 + bl2)
# --------------------------------------------------------------------------
def gin_fused_kernel(adj_ref, x_ref,
                     w1_ref, b1_ref, g_ref, bt_ref, w2_ref, b2_ref,
                     l1w_ref, l1b_ref, l2w_ref, l2b_ref,
                     o_ref):
    adj = adj_ref[...]                    # (N, N) bf16, diag already holds 1+eps
    x = x_ref[...]                        # (N, P)  bf16

    n_layers = w1_ref.shape[0]
    for l in range(n_layers):             # unrolled at trace time
        # (1+eps)*x + sum_{j->i} x_j  ==  (A + (1+eps)I) @ x  (self term folded in glue)
        h = jnp.dot(adj, x, preferred_element_type=jnp.float32)
        z = jnp.dot(h.astype(jnp.bfloat16), w1_ref[l],
                    preferred_element_type=jnp.float32) + b1_ref[l]

        # BatchNorm1d (training mode, biased batch stats over the node axis),
        # folded + centered form: gamma is pre-multiplied into the rsqrt scale
        # and beta is added directly, so the full-(N,P) work is just
        # sub / mul / add / max; centered variance avoids E[z^2]-mean^2
        # cancellation.
        mean = jnp.mean(z, axis=0, keepdims=True)
        centered = z - mean
        var = jnp.mean(centered * centered, axis=0, keepdims=True)
        scale = g_ref[l] * jax.lax.rsqrt(var + BN_EPS)        # (1, P) only
        z = jnp.maximum(centered * scale + bt_ref[l], 0.0)

        z2 = jnp.dot(z.astype(jnp.bfloat16), w2_ref[l],
                     preferred_element_type=jnp.float32) + b2_ref[l]
        x = jnp.maximum(z2, 0.0).astype(jnp.bfloat16)

    # Head: relu(lin1) -> lin2 -> sigmoid.
    h = jnp.dot(x, l1w_ref[...], preferred_element_type=jnp.float32) + l1b_ref[...]
    h = jnp.maximum(h, 0.0)
    logits = jnp.dot(h.astype(jnp.bfloat16), l2w_ref[...],
                     preferred_element_type=jnp.float32) + l2b_ref[...]
    # sigmoid via EUP exp + approximate reciprocal (keeps the divide off the VALU);
    # clamp absorbs the ~1e-3 approximation error so the result stays in [0, 1].
    sig = pl.reciprocal(1.0 + jnp.exp(-logits), approx=True)
    o_ref[...] = jnp.clip(sig, 0.0, 1.0)


# --------------------------------------------------------------------------
# Full GIN forward (glue in plain JAX, hot path entirely inside the kernel).
# --------------------------------------------------------------------------
def gin_forward(x, edge_index, params, num_nodes):
    f_in = x.shape[1]
    hid = params["lin1_w"].shape[0]
    n_class = params["lin2_w"].shape[1]
    P = max(_round_up(f_in, LANE), _round_up(hid, LANE))   # padded feature/hidden dim
    CP = _round_up(n_class, LANE)                          # padded class dim

    # Dense adjacency A[dst, src] += 1 with the (1+eps) self term folded into
    # the diagonal.  Scatter directly in bf16 when edge multiplicities are
    # guaranteed exact (integer counts < 256); otherwise accumulate exactly in
    # f32 and cast.  (Scatter-add has no clean Pallas equivalent -> JAX glue.)
    src, dst = edge_index[0], edge_index[1]
    if edge_index.shape[1] < 256:
        adj = jnp.zeros((num_nodes, num_nodes), jnp.bfloat16).at[dst, src].add(1.0)
    else:
        adj = (jnp.zeros((num_nodes, num_nodes), jnp.float32)
               .at[dst, src].add(1.0).astype(jnp.bfloat16))
    diag = jnp.arange(num_nodes)
    adj = adj.at[diag, diag].add(jnp.bfloat16(1.0 + GIN_EPS))

    x_p = _pad_to(x.astype(jnp.float32), (num_nodes, P)).astype(jnp.bfloat16)

    w1s, b1s, gs, bts, w2s, b2s = [], [], [], [], [], []
    for layer in params["convs"]:
        w1s.append(_pad_to(layer["w1"], (P, P)).astype(jnp.bfloat16))
        b1s.append(_pad_to(layer["b1"].reshape(1, -1), (1, P)))
        gs.append(_pad_to(layer["gamma"].reshape(1, -1), (1, P)))
        bts.append(_pad_to(layer["beta"].reshape(1, -1), (1, P)))
        w2s.append(_pad_to(layer["w2"], (P, P)).astype(jnp.bfloat16))
        b2s.append(_pad_to(layer["b2"].reshape(1, -1), (1, P)))
    w1_stack, b1_stack = jnp.stack(w1s), jnp.stack(b1s)
    g_stack, bt_stack = jnp.stack(gs), jnp.stack(bts)
    w2_stack, b2_stack = jnp.stack(w2s), jnp.stack(b2s)

    l1w = _pad_to(params["lin1_w"], (P, P)).astype(jnp.bfloat16)
    l1b = _pad_to(params["lin1_b"].reshape(1, -1), (1, P))
    l2w = _pad_to(params["lin2_w"], (P, CP)).astype(jnp.bfloat16)
    l2b = _pad_to(params["lin2_b"].reshape(1, -1), (1, CP))

    operands = (adj, x_p, w1_stack, b1_stack, g_stack, bt_stack, w2_stack,
                b2_stack, l1w, l1b, l2w, l2b)

    # Right-size the scoped-VMEM request instead of asking for 64 MiB (which is
    # all of v7x's physical VMEM): actual footprint x2 + 1 MiB headroom, 4 MiB
    # floor.  At this problem size this is well under every generation's
    # scoped default, so it is never a constraint -- just never a hazard.
    footprint = sum(int(a.size) * a.dtype.itemsize for a in operands)
    footprint += num_nodes * CP * 4                       # f32 output
    vmem_limit = max(2 * footprint + (1 << 20), 4 * 1024 * 1024)

    vmem = pl.BlockSpec(memory_space=pltpu.MemorySpace.VMEM)
    out = pl.pallas_call(
        gin_fused_kernel,
        out_shape=jax.ShapeDtypeStruct((num_nodes, CP), jnp.float32),
        in_specs=[vmem] * 12,
        out_specs=vmem,
        compiler_params=pltpu.CompilerParams(vmem_limit_bytes=vmem_limit),
    )(*operands)

    # TODO(synk): scaling plan for large graphs -- the dense, whole-VMEM layout
    # caps out at roughly N~5.6k on v7x (64 MiB physical VMEM, adj = 2*N^2 B)
    # vs ~8k on v5e/v6e (128 MiB).  Beyond that: (1) replace A'@x with a CSR
    # gather-sum driven by PrefetchScalarGridSpec scalar prefetch (O(E*P) flops,
    # no N^2 HBM traffic), (2) grid the node axis with dimension_semantics=
    # ("parallel",) so both v7x TensorCores are used, M-tile 256 on v6e/v7x
    # (2x256^2 MXU) / 128 on v5e, weights kept grid-invariant (index_map
    # lambda i: (0, ...)) so only adj/x/out rows stream and the DMA pipelines
    # behind the matmul, and (3) split BN into two-phase sum/sumsq statistics.
    # At N=16 a single VMEM-resident block is optimal, so none of that is wired
    # in here.  Caller-side batching of multiple graphs along the node axis
    # (block-diagonal adj) is the only way to fill the MXU's M dimension.
    return out[:, :n_class]   # drop the lane-padding on the class dim


# --------------------------------------------------------------------------
# Deterministic parameter construction (synthetic weights).
# --------------------------------------------------------------------------
def init_params(key, n_feat, n_hidden, n_class, n_layers):
    def lin(k, fan_in, fan_out):
        kw, kb = jax.random.split(k)
        bound = 1.0 / jnp.sqrt(fan_in)
        w = jax.random.uniform(kw, (fan_in, fan_out), jnp.float32, -bound, bound)
        b = jax.random.uniform(kb, (fan_out,), jnp.float32, -bound, bound)
        return w, b

    keys = jax.random.split(key, n_layers + 2)
    convs = []
    in_dim = n_feat
    for i in range(n_layers):
        k1, k2 = jax.random.split(keys[i])
        w1, b1 = lin(k1, in_dim, n_hidden)
        w2, b2 = lin(k2, n_hidden, n_hidden)
        convs.append(dict(w1=w1, b1=b1,
                          gamma=jnp.ones((n_hidden,), jnp.float32),
                          beta=jnp.zeros((n_hidden,), jnp.float32),
                          w2=w2, b2=b2))
        in_dim = n_hidden

    lin1_w, lin1_b = lin(keys[n_layers], n_hidden, n_hidden)
    lin2_w, lin2_b = lin(keys[n_layers + 1], n_hidden, n_class)
    return dict(convs=convs, lin1_w=lin1_w, lin1_b=lin1_b,
                lin2_w=lin2_w, lin2_b=lin2_b)


if __name__ == "__main__":
    # Small synthetic graph: 16 nodes, 8 input features, hidden 32, 4 classes,
    # 3 GINConv layers (conv1 + 2 extra), node-level task.
    N, F_IN, HID, N_CLASS, N_LAYERS, N_EDGES = 16, 8, 32, 4, 3, 40

    key = jax.random.PRNGKey(0)
    kx, ke, kp = jax.random.split(key, 3)

    x = jax.random.normal(kx, (N, F_IN), jnp.float32)
    edge_index = jax.random.randint(ke, (2, N_EDGES), 0, N, jnp.int32)
    params = init_params(kp, F_IN, HID, N_CLASS, N_LAYERS)

    fwd = jax.jit(functools.partial(gin_forward, num_nodes=N))
    out = fwd(x, edge_index, params)
    out = jax.block_until_ready(out)

    assert out.shape == (N, N_CLASS)
    assert bool(jnp.all(jnp.isfinite(out)))
    assert bool(jnp.all((out >= 0.0) & (out <= 1.0)))
    print("KERNEL_OK")
</pallas_src>

<mosaic_0001>
module attributes {stable_mosaic.version = 11 : i64} {
  func.func @gin_fused_kernel(%arg0: memref<16x16xbf16, #tpu.memory_space<vmem>>, %arg1: memref<16x128xbf16, #tpu.memory_space<vmem>>, %arg2: memref<3x128x128xbf16, #tpu.memory_space<vmem>>, %arg3: memref<3x1x128xf32, #tpu.memory_space<vmem>>, %arg4: memref<3x1x128xf32, #tpu.memory_space<vmem>>, %arg5: memref<3x1x128xf32, #tpu.memory_space<vmem>>, %arg6: memref<3x128x128xbf16, #tpu.memory_space<vmem>>, %arg7: memref<3x1x128xf32, #tpu.memory_space<vmem>>, %arg8: memref<128x128xbf16, #tpu.memory_space<vmem>>, %arg9: memref<1x128xf32, #tpu.memory_space<vmem>>, %arg10: memref<128x128xbf16, #tpu.memory_space<vmem>>, %arg11: memref<1x128xf32, #tpu.memory_space<vmem>>, %arg12: memref<16x128xf32, #tpu.memory_space<vmem>>) attributes {dimension_semantics = [], scalar_prefetch = 0 : i64, scratch_operands = 0 : i64, tpu.core_type = #tpu.core_type<tc>} {
    %c0 = arith.constant 0 : index
    %c0_0 = arith.constant 0 : index
    %0 = vector.load %arg0[%c0, %c0_0] : memref<16x16xbf16, #tpu.memory_space<vmem>>, vector<16x16xbf16>
    %c0_1 = arith.constant 0 : index
    %c0_2 = arith.constant 0 : index
    %1 = vector.load %arg1[%c0_1, %c0_2] : memref<16x128xbf16, #tpu.memory_space<vmem>>, vector<16x128xbf16>
    %cst = arith.constant dense<0.000000e+00> : vector<16x128xf32>
    %2 = tpu.matmul %0, %1, %cst {dimension_numbers = #tpu.dot_dimension_numbers<[1], [0], [0], [1], [0, 0, 1, 1], [], []>} : vector<16x16xbf16>, vector<16x128xbf16>, vector<16x128xf32> -> vector<16x128xf32>
    %3 = arith.truncf %2 : vector<16x128xf32> to vector<16x128xbf16>
    %c0_3 = arith.constant 0 : index
    %c0_4 = arith.constant 0 : index
    %c0_5 = arith.constant 0 : index
    %4 = vector.load %arg2[%c0_3, %c0_4, %c0_5] : memref<3x128x128xbf16, #tpu.memory_space<vmem>>, vector<1x128x128xbf16>
    %5 = vector.shape_cast %4 : vector<1x128x128xbf16> to vector<128x128xbf16>
    %cst_6 = arith.constant dense<0.000000e+00> : vector<16x128xf32>
    %6 = tpu.matmul %3, %5, %cst_6 {dimension_numbers = #tpu.dot_dimension_numbers<[1], [0], [0], [1], [0, 0, 1, 1], [], []>} : vector<16x128xbf16>, vector<128x128xbf16>, vector<16x128xf32> -> vector<16x128xf32>
    %c0_7 = arith.constant 0 : index
    %c0_8 = arith.constant 0 : index
    %c0_9 = arith.constant 0 : index
    %7 = vector.load %arg3[%c0_7, %c0_8, %c0_9] : memref<3x1x128xf32, #tpu.memory_space<vmem>>, vector<1x1x128xf32>
    %8 = vector.shape_cast %7 : vector<1x1x128xf32> to vector<1x128xf32>
    %9 = vector.broadcast %8 : vector<1x128xf32> to vector<16x128xf32>
    %10 = arith.addf %6, %9 : vector<16x128xf32>
    %cst_10 = arith.constant dense<0.000000e+00> : vector<128xf32>
    %11 = vector.multi_reduction <add>, %10, %cst_10 [0] : vector<16x128xf32> to vector<128xf32>
    %12 = vector.shape_cast %11 : vector<128xf32> to vector<1x128xf32>
    %cst_11 = arith.constant 1.600000e+01 : f32
    %13 = vector.broadcast %cst_11 : f32 to vector<1x128xf32>
    %14 = arith.divf %12, %13 : vector<1x128xf32>
    %15 = vector.broadcast %14 : vector<1x128xf32> to vector<16x128xf32>
    %16 = arith.subf %10, %15 : vector<16x128xf32>
    %17 = arith.mulf %16, %16 : vector<16x128xf32>
    %cst_12 = arith.constant dense<0.000000e+00> : vector<128xf32>
    %18 = vector.multi_reduction <add>, %17, %cst_12 [0] : vector<16x128xf32> to vector<128xf32>
    %19 = vector.shape_cast %18 : vector<128xf32> to vector<1x128xf32>
    %cst_13 = arith.constant 1.600000e+01 : f32
    %20 = vector.broadcast %cst_13 : f32 to vector<1x128xf32>
    %21 = arith.divf %19, %20 : vector<1x128xf32>
    %c0_14 = arith.constant 0 : index
    %c0_15 = arith.constant 0 : index
    %c0_16 = arith.constant 0 : index
    %22 = vector.load %arg4[%c0_14, %c0_15, %c0_16] : memref<3x1x128xf32, #tpu.memory_space<vmem>>, vector<1x1x128xf32>
    %23 = vector.shape_cast %22 : vector<1x1x128xf32> to vector<1x128xf32>
    %cst_17 = arith.constant 9.99999974E-6 : f32
    %24 = vector.broadcast %cst_17 : f32 to vector<1x128xf32>
    %25 = arith.addf %21, %24 : vector<1x128xf32>
    %26 = math.rsqrt %25 : vector<1x128xf32>
    %27 = arith.mulf %23, %26 : vector<1x128xf32>
    %28 = vector.broadcast %27 : vector<1x128xf32> to vector<16x128xf32>
    %29 = arith.mulf %16, %28 : vector<16x128xf32>
    %c0_18 = arith.constant 0 : index
    %c0_19 = arith.constant 0 : index
    %c0_20 = arith.constant 0 : index
    %30 = vector.load %arg5[%c0_18, %c0_19, %c0_20] : memref<3x1x128xf32, #tpu.memory_space<vmem>>, vector<1x1x128xf32>
    %31 = vector.shape_cast %30 : vector<1x1x128xf32> to vector<1x128xf32>
    %32 = vector.broadcast %31 : vector<1x128xf32> to vector<16x128xf32>
    %33 = arith.addf %29, %32 : vector<16x128xf32>
    %cst_21 = arith.constant 0.000000e+00 : f32
    %34 = vector.broadcast %cst_21 : f32 to vector<16x128xf32>
    %35 = arith.maximumf %33, %34 : vector<16x128xf32>
    %36 = arith.truncf %35 : vector<16x128xf32> to vector<16x128xbf16>
    %c0_22 = arith.constant 0 : index
    %c0_23 = arith.constant 0 : index
    %c0_24 = arith.constant 0 : index
    %37 = vector.load %arg6[%c0_22, %c0_23, %c0_24] : memref<3x128x128xbf16, #tpu.memory_space<vmem>>, vector<1x128x128xbf16>
    %38 = vector.shape_cast %37 : vector<1x128x128xbf16> to vector<128x128xbf16>
    %cst_25 = arith.constant dense<0.000000e+00> : vector<16x128xf32>
    %39 = tpu.matmul %36, %38, %cst_25 {dimension_numbers = #tpu.dot_dimension_numbers<[1], [0], [0], [1], [0, 0, 1, 1], [], []>} : vector<16x128xbf16>, vector<128x128xbf16>, vector<16x128xf32> -> vector<16x128xf32>
    %c0_26 = arith.constant 0 : index
    %c0_27 = arith.constant 0 : index
    %c0_28 = arith.constant 0 : index
    %40 = vector.load %arg7[%c0_26, %c0_27, %c0_28] : memref<3x1x128xf32, #tpu.memory_space<vmem>>, vector<1x1x128xf32>
    %41 = vector.shape_cast %40 : vector<1x1x128xf32> to vector<1x128xf32>
    %42 = vector.broadcast %41 : vector<1x128xf32> to vector<16x128xf32>
    %43 = arith.addf %39, %42 : vector<16x128xf32>
    %cst_29 = arith.constant 0.000000e+00 : f32
    %44 = vector.broadcast %cst_29 : f32 to vector<16x128xf32>
    %45 = arith.maximumf %43, %44 : vector<16x128xf32>
    %46 = arith.truncf %45 : vector<16x128xf32> to vector<16x128xbf16>
    %cst_30 = arith.constant dense<0.000000e+00> : vector<16x128xf32>
    %47 = tpu.matmul %0, %46, %cst_30 {dimension_numbers = #tpu.dot_dimension_numbers<[1], [0], [0], [1], [0, 0, 1, 1], [], []>} : vector<16x16xbf16>, vector<16x128xbf16>, vector<16x128xf32> -> vector<16x128xf32>
    %48 = arith.truncf %47 : vector<16x128xf32> to vector<16x128xbf16>
    %c1 = arith.constant 1 : index
    %c0_31 = arith.constant 0 : index
    %c0_32 = arith.constant 0 : index
    %49 = vector.load %arg2[%c1, %c0_31, %c0_32] : memref<3x128x128xbf16, #tpu.memory_space<vmem>>, vector<1x128x128xbf16>
    %50 = vector.shape_cast %49 : vector<1x128x128xbf16> to vector<128x128xbf16>
    %cst_33 = arith.constant dense<0.000000e+00> : vector<16x128xf32>
    %51 = tpu.matmul %48, %50, %cst_33 {dimension_numbers = #tpu.dot_dimension_numbers<[1], [0], [0], [1], [0, 0, 1, 1], [], []>} : vector<16x128xbf16>, vector<128x128xbf16>, vector<16x128xf32> -> vector<16x128xf32>
    %c1_34 = arith.constant 1 : index
    %c0_35 = arith.constant 0 : index
    %c0_36 = arith.constant 0 : index
    %52 = vector.load %arg3[%c1_34, %c0_35, %c0_36] : memref<3x1x128xf32, #tpu.memory_space<vmem>>, vector<1x1x128xf32>
    %53 = vector.shape_cast %52 : vector<1x1x128xf32> to vector<1x128xf32>
    %54 = vector.broadcast %53 : vector<1x128xf32> to vector<16x128xf32>
    %55 = arith.addf %51, %54 : vector<16x128xf32>
    %cst_37 = arith.constant dense<0.000000e+00> : vector<128xf32>
    %56 = vector.multi_reduction <add>, %55, %cst_37 [0] : vector<16x128xf32> to vector<128xf32>
    %57 = vector.shape_cast %56 : vector<128xf32> to vector<1x128xf32>
    %cst_38 = arith.constant 1.600000e+01 : f32
    %58 = vector.broadcast %cst_38 : f32 to vector<1x128xf32>
    %59 = arith.divf %57, %58 : vector<1x128xf32>
    %60 = vector.broadcast %59 : vector<1x128xf32> to vector<16x128xf32>
    %61 = arith.subf %55, %60 : vector<16x128xf32>
    %62 = arith.mulf %61, %61 : vector<16x128xf32>
    %cst_39 = arith.constant dense<0.000000e+00> : vector<128xf32>
    %63 = vector.multi_reduction <add>, %62, %cst_39 [0] : vector<16x128xf32> to vector<128xf32>
    %64 = vector.shape_cast %63 : vector<128xf32> to vector<1x128xf32>
    %cst_40 = arith.constant 1.600000e+01 : f32
    %65 = vector.broadcast %cst_40 : f32 to vector<1x128xf32>
    %66 = arith.divf %64, %65 : vector<1x128xf32>
    %c1_41 = arith.constant 1 : index
    %c0_42 = arith.constant 0 : index
    %c0_43 = arith.constant 0 : index
    %67 = vector.load %arg4[%c1_41, %c0_42, %c0_43] : memref<3x1x128xf32, #tpu.memory_space<vmem>>, vector<1x1x128xf32>
    %68 = vector.shape_cast %67 : vector<1x1x128xf32> to vector<1x128xf32>
    %cst_44 = arith.constant 9.99999974E-6 : f32
    %69 = vector.broadcast %cst_44 : f32 to vector<1x128xf32>
    %70 = arith.addf %66, %69 : vector<1x128xf32>
    %71 = math.rsqrt %70 : vector<1x128xf32>
    %72 = arith.mulf %68, %71 : vector<1x128xf32>
    %73 = vector.broadcast %72 : vector<1x128xf32> to vector<16x128xf32>
    %74 = arith.mulf %61, %73 : vector<16x128xf32>
    %c1_45 = arith.constant 1 : index
    %c0_46 = arith.constant 0 : index
    %c0_47 = arith.constant 0 : index
    %75 = vector.load %arg5[%c1_45, %c0_46, %c0_47] : memref<3x1x128xf32, #tpu.memory_space<vmem>>, vector<1x1x128xf32>
    %76 = vector.shape_cast %75 : vector<1x1x128xf32> to vector<1x128xf32>
    %77 = vector.broadcast %76 : vector<1x128xf32> to vector<16x128xf32>
    %78 = arith.addf %74, %77 : vector<16x128xf32>
    %cst_48 = arith.constant 0.000000e+00 : f32
    %79 = vector.broadcast %cst_48 : f32 to vector<16x128xf32>
    %80 = arith.maximumf %78, %79 : vector<16x128xf32>
    %81 = arith.truncf %80 : vector<16x128xf32> to vector<16x128xbf16>
    %c1_49 = arith.constant 1 : index
    %c0_50 = arith.constant 0 : index
    %c0_51 = arith.constant 0 : index
    %82 = vector.load %arg6[%c1_49, %c0_50, %c0_51] : memref<3x128x128xbf16, #tpu.memory_space<vmem>>, vector<1x128x128xbf16>
    %83 = vector.shape_cast %82 : vector<1x128x128xbf16> to vector<128x128xbf16>
    %cst_52 = arith.constant dense<0.000000e+00> : vector<16x128xf32>
    %84 = tpu.matmul %81, %83, %cst_52 {dimension_numbers = #tpu.dot_dimension_numbers<[1], [0], [0], [1], [0, 0, 1, 1], [], []>} : vector<16x128xbf16>, vector<128x128xbf16>, vector<16x128xf32> -> vector<16x128xf32>
    %c1_53 = arith.constant 1 : index
    %c0_54 = arith.constant 0 : index
    %c0_55 = arith.constant 0 : index
    %85 = vector.load %arg7[%c1_53, %c0_54, %c0_55] : memref<3x1x128xf32, #tpu.memory_space<vmem>>, vector<1x1x128xf32>
    %86 = vector.shape_cast %85 : vector<1x1x128xf32> to vector<1x128xf32>
    %87 = vector.broadcast %86 : vector<1x128xf32> to vector<16x128xf32>
    %88 = arith.addf %84, %87 : vector<16x128xf32>
    %cst_56 = arith.constant 0.000000e+00 : f32
    %89 = vector.broadcast %cst_56 : f32 to vector<16x128xf32>
    %90 = arith.maximumf %88, %89 : vector<16x128xf32>
    %91 = arith.truncf %90 : vector<16x128xf32> to vector<16x128xbf16>
    %cst_57 = arith.constant dense<0.000000e+00> : vector<16x128xf32>
    %92 = tpu.matmul %0, %91, %cst_57 {dimension_numbers = #tpu.dot_dimension_numbers<[1], [0], [0], [1], [0, 0, 1, 1], [], []>} : vector<16x16xbf16>, vector<16x128xbf16>, vector<16x128xf32> -> vector<16x128xf32>
    %93 = arith.truncf %92 : vector<16x128xf32> to vector<16x128xbf16>
    %c2 = arith.constant 2 : index
    %c0_58 = arith.constant 0 : index
    %c0_59 = arith.constant 0 : index
    %94 = vector.load %arg2[%c2, %c0_58, %c0_59] : memref<3x128x128xbf16, #tpu.memory_space<vmem>>, vector<1x128x128xbf16>
    %95 = vector.shape_cast %94 : vector<1x128x128xbf16> to vector<128x128xbf16>
    %cst_60 = arith.constant dense<0.000000e+00> : vector<16x128xf32>
    %96 = tpu.matmul %93, %95, %cst_60 {dimension_numbers = #tpu.dot_dimension_numbers<[1], [0], [0], [1], [0, 0, 1, 1], [], []>} : vector<16x128xbf16>, vector<128x128xbf16>, vector<16x128xf32> -> vector<16x128xf32>
    %c2_61 = arith.constant 2 : index
    %c0_62 = arith.constant 0 : index
    %c0_63 = arith.constant 0 : index
    %97 = vector.load %arg3[%c2_61, %c0_62, %c0_63] : memref<3x1x128xf32, #tpu.memory_space<vmem>>, vector<1x1x128xf32>
    %98 = vector.shape_cast %97 : vector<1x1x128xf32> to vector<1x128xf32>
    %99 = vector.broadcast %98 : vector<1x128xf32> to vector<16x128xf32>
    %100 = arith.addf %96, %99 : vector<16x128xf32>
    %cst_64 = arith.constant dense<0.000000e+00> : vector<128xf32>
    %101 = vector.multi_reduction <add>, %100, %cst_64 [0] : vector<16x128xf32> to vector<128xf32>
    %102 = vector.shape_cast %101 : vector<128xf32> to vector<1x128xf32>
    %cst_65 = arith.constant 1.600000e+01 : f32
    %103 = vector.broadcast %cst_65 : f32 to vector<1x128xf32>
    %104 = arith.divf %102, %103 : vector<1x128xf32>
    %105 = vector.broadcast %104 : vector<1x128xf32> to vector<16x128xf32>
    %106 = arith.subf %100, %105 : vector<16x128xf32>
    %107 = arith.mulf %106, %106 : vector<16x128xf32>
    %cst_66 = arith.constant dense<0.000000e+00> : vector<128xf32>
    %108 = vector.multi_reduction <add>, %107, %cst_66 [0] : vector<16x128xf32> to vector<128xf32>
    %109 = vector.shape_cast %108 : vector<128xf32> to vector<1x128xf32>
    %cst_67 = arith.constant 1.600000e+01 : f32
    %110 = vector.broadcast %cst_67 : f32 to vector<1x128xf32>
    %111 = arith.divf %109, %110 : vector<1x128xf32>
    %c2_68 = arith.constant 2 : index
    %c0_69 = arith.constant 0 : index
    %c0_70 = arith.constant 0 : index
    %112 = vector.load %arg4[%c2_68, %c0_69, %c0_70] : memref<3x1x128xf32, #tpu.memory_space<vmem>>, vector<1x1x128xf32>
    %113 = vector.shape_cast %112 : vector<1x1x128xf32> to vector<1x128xf32>
    %cst_71 = arith.constant 9.99999974E-6 : f32
    %114 = vector.broadcast %cst_71 : f32 to vector<1x128xf32>
    %115 = arith.addf %111, %114 : vector<1x128xf32>
    %116 = math.rsqrt %115 : vector<1x128xf32>
    %117 = arith.mulf %113, %116 : vector<1x128xf32>
    %118 = vector.broadcast %117 : vector<1x128xf32> to vector<16x128xf32>
    %119 = arith.mulf %106, %118 : vector<16x128xf32>
    %c2_72 = arith.constant 2 : index
    %c0_73 = arith.constant 0 : index
    %c0_74 = arith.constant 0 : index
    %120 = vector.load %arg5[%c2_72, %c0_73, %c0_74] : memref<3x1x128xf32, #tpu.memory_space<vmem>>, vector<1x1x128xf32>
    %121 = vector.shape_cast %120 : vector<1x1x128xf32> to vector<1x128xf32>
    %122 = vector.broadcast %121 : vector<1x128xf32> to vector<16x128xf32>
    %123 = arith.addf %119, %122 : vector<16x128xf32>
    %cst_75 = arith.constant 0.000000e+00 : f32
    %124 = vector.broadcast %cst_75 : f32 to vector<16x128xf32>
    %125 = arith.maximumf %123, %124 : vector<16x128xf32>
    %126 = arith.truncf %125 : vector<16x128xf32> to vector<16x128xbf16>
    %c2_76 = arith.constant 2 : index
    %c0_77 = arith.constant 0 : index
    %c0_78 = arith.constant 0 : index
    %127 = vector.load %arg6[%c2_76, %c0_77, %c0_78] : memref<3x128x128xbf16, #tpu.memory_space<vmem>>, vector<1x128x128xbf16>
    %128 = vector.shape_cast %127 : vector<1x128x128xbf16> to vector<128x128xbf16>
    %cst_79 = arith.constant dense<0.000000e+00> : vector<16x128xf32>
    %129 = tpu.matmul %126, %128, %cst_79 {dimension_numbers = #tpu.dot_dimension_numbers<[1], [0], [0], [1], [0, 0, 1, 1], [], []>} : vector<16x128xbf16>, vector<128x128xbf16>, vector<16x128xf32> -> vector<16x128xf32>
    %c2_80 = arith.constant 2 : index
    %c0_81 = arith.constant 0 : index
    %c0_82 = arith.constant 0 : index
    %130 = vector.load %arg7[%c2_80, %c0_81, %c0_82] : memref<3x1x128xf32, #tpu.memory_space<vmem>>, vector<1x1x128xf32>
    %131 = vector.shape_cast %130 : vector<1x1x128xf32> to vector<1x128xf32>
    %132 = vector.broadcast %131 : vector<1x128xf32> to vector<16x128xf32>
    %133 = arith.addf %129, %132 : vector<16x128xf32>
    %cst_83 = arith.constant 0.000000e+00 : f32
    %134 = vector.broadcast %cst_83 : f32 to vector<16x128xf32>
    %135 = arith.maximumf %133, %134 : vector<16x128xf32>
    %136 = arith.truncf %135 : vector<16x128xf32> to vector<16x128xbf16>
    %c0_84 = arith.constant 0 : index
    %c0_85 = arith.constant 0 : index
    %137 = vector.load %arg8[%c0_84, %c0_85] : memref<128x128xbf16, #tpu.memory_space<vmem>>, vector<128x128xbf16>
    %cst_86 = arith.constant dense<0.000000e+00> : vector<16x128xf32>
    %138 = tpu.matmul %136, %137, %cst_86 {dimension_numbers = #tpu.dot_dimension_numbers<[1], [0], [0], [1], [0, 0, 1, 1], [], []>} : vector<16x128xbf16>, vector<128x128xbf16>, vector<16x128xf32> -> vector<16x128xf32>
    %c0_87 = arith.constant 0 : index
    %c0_88 = arith.constant 0 : index
    %139 = vector.load %arg9[%c0_87, %c0_88] : memref<1x128xf32, #tpu.memory_space<vmem>>, vector<1x128xf32>
    %140 = vector.broadcast %139 : vector<1x128xf32> to vector<16x128xf32>
    %141 = arith.addf %138, %140 : vector<16x128xf32>
    %cst_89 = arith.constant 0.000000e+00 : f32
    %142 = vector.broadcast %cst_89 : f32 to vector<16x128xf32>
    %143 = arith.maximumf %141, %142 : vector<16x128xf32>
    %144 = arith.truncf %143 : vector<16x128xf32> to vector<16x128xbf16>
    %c0_90 = arith.constant 0 : index
    %c0_91 = arith.constant 0 : index
    %145 = vector.load %arg10[%c0_90, %c0_91] : memref<128x128xbf16, #tpu.memory_space<vmem>>, vector<128x128xbf16>
    %cst_92 = arith.constant dense<0.000000e+00> : vector<16x128xf32>
    %146 = tpu.matmul %144, %145, %cst_92 {dimension_numbers = #tpu.dot_dimension_numbers<[1], [0], [0], [1], [0, 0, 1, 1], [], []>} : vector<16x128xbf16>, vector<128x128xbf16>, vector<16x128xf32> -> vector<16x128xf32>
    %c0_93 = arith.constant 0 : index
    %c0_94 = arith.constant 0 : index
    %147 = vector.load %arg11[%c0_93, %c0_94] : memref<1x128xf32, #tpu.memory_space<vmem>>, vector<1x128xf32>
    %148 = vector.broadcast %147 : vector<1x128xf32> to vector<16x128xf32>
    %149 = arith.addf %146, %148 : vector<16x128xf32>
    %cst_95 = arith.constant 0.000000e+00 : f32
    %150 = vector.broadcast %cst_95 : f32 to vector<16x128xf32>
    %151 = arith.subf %150, %149 : vector<16x128xf32>
    %152 = math.exp %151 : vector<16x128xf32>
    %cst_96 = arith.constant 1.000000e+00 : f32
    %153 = vector.broadcast %cst_96 : f32 to vector<16x128xf32>
    %154 = arith.addf %153, %152 : vector<16x128xf32>
    %155 = tpu.reciprocal %154 {approx = true} : vector<16x128xf32> -> vector<16x128xf32>
    %cst_97 = arith.constant 0.000000e+00 : f32
    %cst_98 = arith.constant 1.000000e+00 : f32
    %156 = vector.broadcast %cst_97 : f32 to vector<16x128xf32>
    %157 = arith.maximumf %156, %155 : vector<16x128xf32>
    %158 = vector.broadcast %cst_98 : f32 to vector<16x128xf32>
    %159 = arith.minimumf %158, %157 : vector<16x128xf32>
    %c0_99 = arith.constant 0 : index
    %c0_100 = arith.constant 0 : index
    %160 = vector.load %arg12[%c0_99, %c0_100] : memref<16x128xf32, #tpu.memory_space<vmem>>, vector<16x128xf32>
    tpu.vector_store %arg12[%c0_99, %c0_100], %159 {strides = array<i32>} : memref<16x128xf32, #tpu.memory_space<vmem>>, vector<16x128xf32>,
    return
  }
}

</mosaic_0001>

<bundles_post_ra>
// kernel: gin_forward.1
= control target key start
LH: loop header
LB: loop body
LE: loop exit
PB: predicated region body
PF: predicated region fallthrough
CT: control target
= control target key end

     0   :  { %v1750_v0 = vmov 0.0   ;;  %vm1751_vm0 = vmmov 0   ;;  %vm57_vm1 = vcmask 130048   ;;  %v241_v52 = vlaneseq  ;;  %s2165_s1 = inlined_call_operand.vmem [shape: bf16[16,128], index: 1, kind: input, shape index: {}]   ;;  %s2166_s0 = inlined_call_operand.vmem [shape: bf16[16,16], index: 0, kind: input, shape index: {}]   ;;  %s2167_s2 = inlined_call_operand.vmem [shape: bf16[3,128,128], index: 2, kind: input, shape index: {}]   ;;  %s2168_s6 = inlined_call_operand.vmem [shape: bf16[3,128,128], index: 6, kind: input, shape index: {}]   ;;  %s2169_s3 = inlined_call_operand.vmem [shape: f32[3,1,128], index: 3, kind: input, shape index: {}]   ;;  %s2170_s4 = inlined_call_operand.vmem [shape: f32[3,1,128], index: 4, kind: input, shape index: {}]   ;;  %s2171_s5 = inlined_call_operand.vmem [shape: f32[3,1,128], index: 5, kind: input, shape index: {}]   ;;  %s2172_s7 = inlined_call_operand.vmem [shape: f32[3,1,128], index: 7, kind: input, shape index: {}]   ;;  %s2173_s8 = inlined_call_operand.vmem [shape: bf16[128,128], index: 8, kind: input, shape index: {}]   ;;  %s2174_s10 = inlined_call_operand.vmem [shape: bf16[128,128], index: 10, kind: input, shape index: {}]   ;;  %s2175_s9 = inlined_call_operand.vmem [shape: f32[1,128], index: 9, kind: input, shape index: {}]   ;;  %s2176_s11 = inlined_call_operand.vmem [shape: f32[1,128], index: 11, kind: input, shape index: {}]   ;;  %s2177_s12 = inlined_call_operand.vmem [shape: f32[16,128], index: 12, kind: output, shape index: {}]  }
   0x1   :  { %1490 = vmatprep.subr.bf16.mxu0 %v1750_v0  ;;  %v1670_v1 = vld [vmem:[%s2165_s1] sm:$0xff]   ;;  %1492 = vmatprep.mubr.msk.bf16.mxu0 %vm1751_vm0, %v1750_v0  ;;  %v1673_v4 = vld [vmem:[%s2167_s2 + $0x8] sm:$0xff]   ;;  %v1674_v5 = vld [vmem:[%s2167_s2 + $0x10] sm:$0xff]  }
   0x2   :  { %v1826_v2 = vld [vmem:[%s2166_s0] sm:$0xff]   ;;  %1496 = vmatprep.subr.bf16.mxu1 %v1750_v0  ;;  %1512 = vmatprep.mubr.msk.bf16.mxu1 %vm1751_vm0, %v1750_v0  ;;  %v1675_v6 = vld [vmem:[%s2167_s2 + $0x18] sm:$0xff]   ;;  %v1677_v8 = vld [vmem:[%s2167_s2 + $0x28] sm:$0xff]   ;;  %v242_v53 = vshrl.u32 %v241_v52, 7 }
   0x3   :  { %1491 = vmatpush3.bf16.msra.mxu0 %v1670_v1  ;;  %v1672_v3 = vld [vmem:[%s2167_s2] sm:$0xff]   ;;  %v1678_v9 = vld [vmem:[%s2167_s2 + $0x30] sm:$0xff]   ;;  %v1679_v10 = vld [vmem:[%s2167_s2 + $0x38] sm:$0xff]  }
   0x4   :  { %1516 = vmatprep.subr.bf16.mxu0 %v1750_v0  ;;  %1497 = vmatpush3.bf16.msra.mxu1 %v1672_v3  ;;  %v1676_v7 = vld [vmem:[%s2167_s2 + $0x20] sm:$0xff]   ;;  %v1681_v17 = vld [vmem:[%s2168_s6 + $0x8] sm:$0xff]   ;;  %v1682_v18 = vld [vmem:[%s2168_s6 + $0x10] sm:$0xff]   ;;  %v1908_v55 = vsub.s32 0, %v242_v53 }
   0x5   :  { %1498 = vmatprep.subr.bf16.mxu1 %v1750_v0  ;;  %v1680_v16 = vld [vmem:[%s2168_s6] sm:$0xff]   ;;  %v1683_v19 = vld [vmem:[%s2168_s6 + $0x18] sm:$0xff]   ;;  %v1685_v21 = vld [vmem:[%s2168_s6 + $0x28] sm:$0xff]  }
   0x6   :  { %1493 = vmatmul.mubr.msk.bf16.vlgmr.msra.gmra.mrb[0].mxu0 %vm57_vm1, %v1826_v2  ;;  %v1684_v20 = vld [vmem:[%s2168_s6 + $0x20] sm:$0xff]   ;;  %v1686_v22 = vld [vmem:[%s2168_s6 + $0x30] sm:$0xff]   ;;  %v1687_v23 = vld [vmem:[%s2168_s6 + $0x38] sm:$0xff]  }
   0x7   :  { %1532 = vmatprep.mubr.msk.bf16.mxu0 %vm1751_vm0, %v1750_v0  ;;  %1517 = vmatpush3.bf16.msra.mxu0 %v1680_v16  ;;  %v1263_v24 = vld [vmem:[%s2169_s3] ss:$0 sm:$0xff] }
   0x8   :  { %1499 = vmatpush3.bf16.msra.mxu1 %v1673_v4  ;;  %1518 = vmatprep.subr.bf16.mxu0 %v1750_v0  ;;  %v236_v54 = vld [vmem:[%s2170_s4] sm:$0x1] }
   0x9   :  { %1500 = vmatprep.subr.bf16.mxu1 %v1750_v0  ;;  %v1272_v59 = vld [vmem:[%s2171_s5] ss:$0 sm:$0xff] }
   0xb   :  { %1519 = vmatpush3.bf16.msra.mxu0 %v1681_v17 }
   0xc   :  { %1501 = vmatpush3.bf16.msra.mxu1 %v1674_v5  ;;  %1520 = vmatprep.subr.bf16.mxu0 %v1750_v0  ;;  %v1688_v5 = vld [vmem:[%s2167_s2 + $0x40] sm:$0xff]  }
   0xd   :  { %1502 = vmatprep.subr.bf16.mxu1 %v1750_v0 }
   0xf   :  { %1521 = vmatpush3.bf16.msra.mxu0 %v1682_v18 }
  0x10   :  { %1503 = vmatpush3.bf16.msra.mxu1 %v1675_v6  ;;  %1522 = vmatprep.subr.bf16.mxu0 %v1750_v0  ;;  %v1689_v6 = vld [vmem:[%s2167_s2 + $0x48] sm:$0xff]  }
  0x11   :  { %1504 = vmatprep.subr.bf16.mxu1 %v1750_v0 }
  0x13   :  { %1523 = vmatpush3.bf16.msra.mxu0 %v1683_v19 }
  0x14   :  { %1505 = vmatpush3.bf16.msra.mxu1 %v1676_v7  ;;  %1524 = vmatprep.subr.bf16.mxu0 %v1750_v0  ;;  %v1690_v7 = vld [vmem:[%s2167_s2 + $0x50] sm:$0xff]  }
  0x15   :  { %1506 = vmatprep.subr.bf16.mxu1 %v1750_v0 }
  0x17   :  { %1525 = vmatpush3.bf16.msra.mxu0 %v1684_v20 }
  0x18   :  { %1507 = vmatpush3.bf16.msra.mxu1 %v1677_v8  ;;  %1526 = vmatprep.subr.bf16.mxu0 %v1750_v0  ;;  %v1691_v8 = vld [vmem:[%s2167_s2 + $0x58] sm:$0xff]  }
  0x19   :  { %1508 = vmatprep.subr.bf16.mxu1 %v1750_v0 }
  0x1b   :  { %1527 = vmatpush3.bf16.msra.mxu0 %v1685_v21 }
  0x1c   :  { %1509 = vmatpush3.bf16.msra.mxu1 %v1678_v9  ;;  %1528 = vmatprep.subr.bf16.mxu0 %v1750_v0  ;;  %v1692_v9 = vld [vmem:[%s2167_s2 + $0x60] sm:$0xff]  }
  0x1d   :  { %1510 = vmatprep.subr.bf16.mxu1 %v1750_v0 }
  0x1f   :  { %1529 = vmatpush3.bf16.msra.mxu0 %v1686_v22  ;;  %v1695_v22 = vld [vmem:[%s2167_s2 + $0x78] sm:$0xff]  }
  0x20   :  { %1511 = vmatpush3.bf16.msra.mxu1 %v1679_v10  ;;  %1530 = vmatprep.subr.bf16.mxu0 %v1750_v0  ;;  %v1693_v10 = vld [vmem:[%s2167_s2 + $0x68] sm:$0xff]  }
  0x21   :  { %1536 = vmatprep.subr.bf16.mxu1 %v1750_v0 }
  0x23   :  { %1531 = vmatpush3.bf16.msra.mxu0 %v1687_v23 }
  0x24   :  { %1542 = vmatprep.subr.bf16.mxu0 %v1750_v0 }
  0xd9   :  { %v95_v11 = vpop.f32.mrb[0].mxu0 }
  0xda   :  { %v1494_v12 = vpop.f32.mrb[1].mxu0 }
  0xdb   :  { %v98_v13 = vpop.f32.mrb[2].mxu0  ;;  %v1273_v12 = vld [vmem:[%s2172_s7] ss:$0 sm:$0xff] }
  0xdc   :  { %v102_v14 = vpack.c.bf16 %v98_v13, %v95_v11  ;;  %v1495_v15 = vpop.f32.mrb[3].mxu0  ;;  %v1694_v11 = vld [vmem:[%s2167_s2 + $0x70] sm:$0xff]  }
  0xde   :  { %1513 = vmatmul.mubr.bf16.vlgmr.msra.gmra.mrb[0].mxu1 %v102_v14 }
  0xdf   :  { %1538 = vmatprep.mubr.msk.bf16.mxu1 %vm1751_vm0, %v1750_v0 }
 0x1b1   :  { %v208_v25 = vpop.f32.mrb[0].mxu1 }
 0x1b2   :  { %v1514_v26 = vpop.f32.mrb[1].mxu1  ;;  %v209_v28 = vadd.f32 %v1263_v24, %v208_v25 }
 0x1b3   :  { %v211_v27 = vpop.f32.mrb[2].mxu1 }
 0x1b4   :  { %v212_v29 = vadd.f32 %v1263_v24, %v211_v27  ;;  %v1515_v30 = vpop.f32.mrb[3].mxu1 }
 0x1b5   :  { %v1698_v30 = vld [vmem:[%s2168_s6 + $0x50] sm:$0xff]  }
 0x1b6   :  { %v215_v31 = vadd.f32 %v212_v29, %v209_v28 }
 0x1b8   :  { %v216_v32 = vrot.slane %v215_v31, 4 }
 0x1ba   :  { %v217_v33 = vadd.f32 %v216_v32, %v215_v31  ;;  %v1699_v31 = vld [vmem:[%s2168_s6 + $0x58] sm:$0xff]   ;;  %v1700_v32 = vld [vmem:[%s2168_s6 + $0x60] sm:$0xff]  }
 0x1bc   :  { %v218_v34 = vrot.slane %v217_v33, 2 }
 0x1be   :  { %v219_v35 = vadd.f32 %v218_v34, %v217_v33  ;;  %v1701_v33 = vld [vmem:[%s2168_s6 + $0x68] sm:$0xff]   ;;  %v1702_v34 = vld [vmem:[%s2168_s6 + $0x70] sm:$0xff]  }
 0x1c0   :  { %v220_v36 = vrot.slane %v219_v35, 1 }
 0x1c2   :  { %v221_v37 = vadd.f32 %v220_v36, %v219_v35  ;;  %v1703_v35 = vld [vmem:[%s2168_s6 + $0x78] sm:$0xff]   ;;  %v1300_v36 = vld [vmem:[%s2169_s3 + $0x1] ss:$0 sm:$0xff] }
 0x1c4   :  { %v223_v38 = vmul.f32 0.0625, %v221_v37 }
 0x1c6   :  { %v224_v39 = vsub.f32 %v209_v28, %v223_v38  ;;  %v225_v40 = vsub.f32 %v212_v29, %v223_v38  ;;  %v1696_v28 = vld [vmem:[%s2168_s6 + $0x40] sm:$0xff]   ;;  %v1697_v29 = vld [vmem:[%s2168_s6 + $0x48] sm:$0xff]  }
 0x1c8   :  { %v226_v41 = vmul.f32 %v224_v39, %v224_v39  ;;  %v227_v42 = vmul.f32 %v225_v40, %v225_v40 }
 0x1ca   :  { %v228_v43 = vadd.f32 %v227_v42, %v226_v41 }
 0x1cc   :  { %v229_v44 = vrot.slane %v228_v43, 4 }
 0x1ce   :  { %v230_v45 = vadd.f32 %v229_v44, %v228_v43 }
 0x1d0   :  { %v231_v46 = vrot.slane %v230_v45, 2 }
 0x1d2   :  { %v232_v47 = vadd.f32 %v231_v46, %v230_v45 }
 0x1d4   :  { %v233_v48 = vrot.slane %v232_v47, 1 }
 0x1d6   :  { %v234_v49 = vadd.f32 %v233_v48, %v232_v47 }
 0x1d8   :  { %v235_v50 = vmul.f32 0.0625, %v234_v49 }
 0x1da   :  { %v237_v51 = vadd.f32 1e-05, %v235_v50 }
 0x1dc   :  { %1736 = vrsqrt.f32 %v237_v51 }
 0x1e6   :  { %v1737_v56 = vpop.eup %1736 }
 0x1e7   :  { %v239_v57 = vmul.f32 %v1737_v56, %v236_v54 }
 0x1e9   :  { %v244_v58 = vrot.slane %v239_v57, %v1908_v55 }
 0x1eb   :  { %v246_v60 = vmul.f32 %v244_v58, %v224_v39  ;;  %v247_v61 = vmul.f32 %v244_v58, %v225_v40 }
 0x1ed   :  { %v255_v62 = vadd.f32 %v1272_v59, %v246_v60  ;;  %v256_v63 = vadd.f32 %v1272_v59, %v247_v61 }
 0x1ef   :  { %v257_v1 = vmax.f32 %v255_v62, 0.0  ;;  %v258_v3 = vmax.f32 %v256_v63, 0.0 }
 0x1f1   :  { %v259_v4 = vpack.c.bf16 %v258_v3, %v257_v1  ;;  %v1309_v3 = vld [vmem:[%s2170_s4 + $0x1] sm:$0x1] }
 0x1f3   :  { %1533 = vmatmul.mubr.bf16.vlgmr.msra.gmra.mrb[4].mxu0 %v259_v4 }
 0x1f4   :  { %1558 = vmatprep.mubr.msk.bf16.mxu0 %vm1751_vm0, %v1750_v0  ;;  %1543 = vmatpush3.bf16.msra.mxu0 %v1688_v5 }
 0x1f5   :  { %1544 = vmatprep.subr.bf16.mxu0 %v1750_v0 }
 0x1f8   :  { %1545 = vmatpush3.bf16.msra.mxu0 %v1689_v6 }
 0x1f9   :  { %1546 = vmatprep.subr.bf16.mxu0 %v1750_v0 }
 0x1fc   :  { %1547 = vmatpush3.bf16.msra.mxu0 %v1690_v7  ;;  %v1311_v7 = vld [vmem:[%s2171_s5 + $0x1] ss:$0 sm:$0xff] }
 0x1fd   :  { %1548 = vmatprep.subr.bf16.mxu0 %v1750_v0 }
 0x200   :  { %1549 = vmatpush3.bf16.msra.mxu0 %v1691_v8 }
 0x201   :  { %1550 = vmatprep.subr.bf16.mxu0 %v1750_v0 }
 0x204   :  { %1551 = vmatpush3.bf16.msra.mxu0 %v1692_v9 }
 0x205   :  { %1552 = vmatprep.subr.bf16.mxu0 %v1750_v0 }
 0x208   :  { %1553 = vmatpush3.bf16.msra.mxu0 %v1693_v10 }
 0x209   :  { %1554 = vmatprep.subr.bf16.mxu0 %v1750_v0 }
 0x20c   :  { %1555 = vmatpush3.bf16.msra.mxu0 %v1694_v11 }
 0x20d   :  { %1556 = vmatprep.subr.bf16.mxu0 %v1750_v0 }
 0x210   :  { %1557 = vmatpush3.bf16.msra.mxu0 %v1695_v22  ;;  %v1329_v22 = vld [vmem:[%s2172_s7 + $0x1] ss:$0 sm:$0xff] }
 0x211   :  { %1582 = vmatprep.subr.bf16.mxu0 %v1750_v0 }
 0x2c6   :  { %v365_v13 = vpop.f32.mrb[4].mxu0 }
 0x2c7   :  { %v366_v14 = vadd.f32 %v1273_v12, %v365_v13  ;;  %v1534_v15 = vpop.f32.mrb[5].mxu0 }
 0x2c8   :  { %v368_v16 = vpop.f32.mrb[6].mxu0  ;;  %v1704_v15 = vld [vmem:[%s2167_s2 + $0x80] sm:$0xff]  }
 0x2c9   :  { %v369_v17 = vadd.f32 %v1273_v12, %v368_v16  ;;  %v1535_v18 = vpop.f32.mrb[7].mxu0  ;;  %v372_v19 = vmax.f32 %v366_v14, 0.0  ;;  %v1705_v16 = vld [vmem:[%s2167_s2 + $0x88] sm:$0xff]  }
 0x2ca   :  { %v1707_v18 = vld [vmem:[%s2167_s2 + $0x98] sm:$0xff]  }
 0x2cb   :  { %v373_v20 = vmax.f32 %v369_v17, 0.0  ;;  %v1706_v17 = vld [vmem:[%s2167_s2 + $0x90] sm:$0xff]  }
 0x2cd   :  { %v374_v21 = vpack.c.bf16 %v373_v20, %v372_v19  ;;  %v1708_v19 = vld [vmem:[%s2167_s2 + $0xa0] sm:$0xff]   ;;  %v1709_v20 = vld [vmem:[%s2167_s2 + $0xa8] sm:$0xff]  }
 0x2cf   :  { %1537 = vmatpush3.bf16.msra.mxu1 %v374_v21  ;;  %v1710_v21 = vld [vmem:[%s2167_s2 + $0xb0] sm:$0xff]  }
 0x2d0   :  { %1562 = vmatprep.subr.bf16.mxu1 %v1750_v0 }
 0x2d2   :  { %1539 = vmatmul.mubr.msk.bf16.vlgmr.msra.gmra.mrb[4].mxu1 %vm57_vm1, %v1826_v2 }
 0x2d3   :  { %1578 = vmatprep.mubr.msk.bf16.mxu1 %vm1751_vm0, %v1750_v0  ;;  %1563 = vmatpush3.bf16.msra.mxu1 %v1696_v28 }
 0x2d4   :  { %1564 = vmatprep.subr.bf16.mxu1 %v1750_v0 }
 0x2d7   :  { %1565 = vmatpush3.bf16.msra.mxu1 %v1697_v29 }
 0x2d8   :  { %1566 = vmatprep.subr.bf16.mxu1 %v1750_v0 }
 0x2db   :  { %1567 = vmatpush3.bf16.msra.mxu1 %v1698_v30 }
 0x2dc   :  { %1568 = vmatprep.subr.bf16.mxu1 %v1750_v0 }
 0x2df   :  { %1569 = vmatpush3.bf16.msra.mxu1 %v1699_v31 }
 0x2e0   :  { %1570 = vmatprep.subr.bf16.mxu1 %v1750_v0 }
 0x2e3   :  { %1571 = vmatpush3.bf16.msra.mxu1 %v1700_v32  ;;  %v1711_v32 = vld [vmem:[%s2167_s2 + $0xb8] sm:$0xff]  }
 0x2e4   :  { %1572 = vmatprep.subr.bf16.mxu1 %v1750_v0 }
 0x2e7   :  { %1573 = vmatpush3.bf16.msra.mxu1 %v1701_v33 }
 0x2e8   :  { %1574 = vmatprep.subr.bf16.mxu1 %v1750_v0 }
 0x2eb   :  { %1575 = vmatpush3.bf16.msra.mxu1 %v1702_v34 }
 0x2ec   :  { %1576 = vmatprep.subr.bf16.mxu1 %v1750_v0 }
 0x2ef   :  { %1577 = vmatpush3.bf16.msra.mxu1 %v1703_v35 }
 0x2f0   :  { %1588 = vmatprep.subr.bf16.mxu1 %v1750_v0 }
 0x3a5   :  { %v409_v23 = vpop.f32.mrb[4].mxu1 }
 0x3a6   :  { %v1540_v24 = vpop.f32.mrb[5].mxu1 }
 0x3a7   :  { %v412_v25 = vpop.f32.mrb[6].mxu1 }
 0x3a8   :  { %v416_v26 = vpack.c.bf16 %v412_v25, %v409_v23  ;;  %v1541_v27 = vpop.f32.mrb[7].mxu1 }
 0x3aa   :  { %1559 = vmatmul.mubr.bf16.vlgmr.msra.gmra.mrb[8].mxu0 %v416_v26 }
 0x3ab   :  { %1584 = vmatprep.mubr.msk.bf16.mxu0 %vm1751_vm0, %v1750_v0 }
 0x47d   :  { %v524_v37 = vpop.f32.mrb[8].mxu0 }
 0x47e   :  { %v1560_v38 = vpop.f32.mrb[9].mxu0  ;;  %v525_v40 = vadd.f32 %v1300_v36, %v524_v37 }
 0x47f   :  { %v527_v39 = vpop.f32.mrb[10].mxu0  ;;  %v1713_v38 = vld [vmem:[%s2168_s6 + $0x88] sm:$0xff]  }
 0x480   :  { %v528_v41 = vadd.f32 %v1300_v36, %v527_v39  ;;  %v1561_v42 = vpop.f32.mrb[11].mxu0  ;;  %v1714_v39 = vld [vmem:[%s2168_s6 + $0x90] sm:$0xff]  }
 0x481   :  { %v1717_v42 = vld [vmem:[%s2168_s6 + $0xa8] sm:$0xff]  }
 0x482   :  { %v531_v43 = vadd.f32 %v528_v41, %v525_v40 }
 0x484   :  { %v532_v44 = vrot.slane %v531_v43, 4 }
 0x486   :  { %v533_v45 = vadd.f32 %v532_v44, %v531_v43  ;;  %v1718_v43 = vld [vmem:[%s2168_s6 + $0xb0] sm:$0xff]   ;;  %v1719_v44 = vld [vmem:[%s2168_s6 + $0xb8] sm:$0xff]  }
 0x488   :  { %v534_v46 = vrot.slane %v533_v45, 2 }
 0x48a   :  { %v535_v47 = vadd.f32 %v534_v46, %v533_v45  ;;  %v1720_v45 = vld [vmem:[%s2173_s8] sm:$0xff]   ;;  %v1721_v46 = vld [vmem:[%s2173_s8 + $0x8] sm:$0xff]  }
 0x48c   :  { %v536_v48 = vrot.slane %v535_v47, 1 }
 0x48e   :  { %v537_v49 = vadd.f32 %v536_v48, %v535_v47  ;;  %v1722_v47 = vld [vmem:[%s2173_s8 + $0x10] sm:$0xff]   ;;  %v1723_v48 = vld [vmem:[%s2173_s8 + $0x18] sm:$0xff]  }
 0x490   :  { %v538_v50 = vmul.f32 0.0625, %v537_v49  ;;  %v1724_v49 = vld [vmem:[%s2173_s8 + $0x20] sm:$0xff]  }
 0x492   :  { %v539_v51 = vsub.f32 %v525_v40, %v538_v50  ;;  %v540_v52 = vsub.f32 %v528_v41, %v538_v50  ;;  %v1715_v40 = vld [vmem:[%s2168_s6 + $0x98] sm:$0xff]   ;;  %v1716_v41 = vld [vmem:[%s2168_s6 + $0xa0] sm:$0xff]   ;;  %v1725_v50 = vld [vmem:[%s2173_s8 + $0x28] sm:$0xff]  }
 0x494   :  { %v541_v53 = vmul.f32 %v539_v51, %v539_v51  ;;  %v542_v54 = vmul.f32 %v540_v52, %v540_v52 }
 0x496   :  { %v543_v56 = vadd.f32 %v542_v54, %v541_v53 }
 0x498   :  { %v544_v57 = vrot.slane %v543_v56, 4 }
 0x49a   :  { %v545_v58 = vadd.f32 %v544_v57, %v543_v56 }
 0x49c   :  { %v546_v59 = vrot.slane %v545_v58, 2 }
 0x49e   :  { %v547_v60 = vadd.f32 %v546_v59, %v545_v58 }
 0x4a0   :  { %v548_v61 = vrot.slane %v547_v60, 1 }
 0x4a2   :  { %v549_v62 = vadd.f32 %v548_v61, %v547_v60 }
 0x4a4   :  { %v550_v63 = vmul.f32 0.0625, %v549_v62 }
 0x4a6   :  { %v553_v1 = vadd.f32 1e-05, %v550_v63 }
 0x4a8   :  { %1738 = vrsqrt.f32 %v553_v1 }
 0x4b2   :  { %v1739_v4 = vpop.eup %1738 }
 0x4b3   :  { %v555_v5 = vmul.f32 %v1739_v4, %v1309_v3 }
 0x4b5   :  { %v560_v6 = vrot.slane %v555_v5, %v1908_v55 }
 0x4b7   :  { %v562_v8 = vmul.f32 %v560_v6, %v539_v51  ;;  %v563_v9 = vmul.f32 %v560_v6, %v540_v52  ;;  %v1356_v51 = vld [vmem:[%s2169_s3 + $0x2] ss:$0 sm:$0xff] }
 0x4b9   :  { %v572_v10 = vadd.f32 %v1311_v7, %v562_v8  ;;  %v573_v11 = vadd.f32 %v1311_v7, %v563_v9 }
 0x4bb   :  { %v574_v12 = vmax.f32 %v572_v10, 0.0  ;;  %v575_v13 = vmax.f32 %v573_v11, 0.0 }
 0x4bd   :  { %v576_v14 = vpack.c.bf16 %v575_v13, %v574_v12 }
 0x4bf   :  { %1579 = vmatmul.mubr.bf16.vlgmr.msra.gmra.mrb[8].mxu1 %v576_v14 }
 0x4c0   :  { %1604 = vmatprep.mubr.msk.bf16.mxu1 %vm1751_vm0, %v1750_v0  ;;  %1589 = vmatpush3.bf16.msra.mxu1 %v1704_v15 }
 0x4c1   :  { %1590 = vmatprep.subr.bf16.mxu1 %v1750_v0 }
 0x4c4   :  { %1591 = vmatpush3.bf16.msra.mxu1 %v1705_v16 }
 0x4c5   :  { %1592 = vmatprep.subr.bf16.mxu1 %v1750_v0 }
 0x4c8   :  { %1593 = vmatpush3.bf16.msra.mxu1 %v1706_v17 }
 0x4c9   :  { %1594 = vmatprep.subr.bf16.mxu1 %v1750_v0 }
 0x4cc   :  { %1595 = vmatpush3.bf16.msra.mxu1 %v1707_v18  ;;  %v1365_v18 = vld [vmem:[%s2170_s4 + $0x2] sm:$0x1] }
 0x4cd   :  { %1596 = vmatprep.subr.bf16.mxu1 %v1750_v0 }
 0x4d0   :  { %1597 = vmatpush3.bf16.msra.mxu1 %v1708_v19 }
 0x4d1   :  { %1598 = vmatprep.subr.bf16.mxu1 %v1750_v0 }
 0x4d4   :  { %1599 = vmatpush3.bf16.msra.mxu1 %v1709_v20 }
 0x4d5   :  { %1600 = vmatprep.subr.bf16.mxu1 %v1750_v0 }
 0x4d8   :  { %1601 = vmatpush3.bf16.msra.mxu1 %v1710_v21 }
 0x4d9   :  { %1602 = vmatprep.subr.bf16.mxu1 %v1750_v0 }
 0x4dc   :  { %1603 = vmatpush3.bf16.msra.mxu1 %v1711_v32  ;;  %v1729_v32 = vld [vmem:[%s2174_s10 + $0x8] sm:$0xff]  }
 0x4dd   :  { %1628 = vmatprep.subr.bf16.mxu1 %v1750_v0 }
 0x592   :  { %v684_v23 = vpop.f32.mrb[8].mxu1 }
 0x593   :  { %v685_v24 = vadd.f32 %v1329_v22, %v684_v23  ;;  %v1580_v25 = vpop.f32.mrb[9].mxu1 }
 0x594   :  { %v687_v26 = vpop.f32.mrb[10].mxu1 }
 0x595   :  { %v688_v27 = vadd.f32 %v1329_v22, %v687_v26  ;;  %v1581_v28 = vpop.f32.mrb[11].mxu1  ;;  %v691_v29 = vmax.f32 %v685_v24, 0.0  ;;  %v1367_v22 = vld [vmem:[%s2171_s5 + $0x2] ss:$0 sm:$0xff] }
 0x597   :  { %v692_v30 = vmax.f32 %v688_v27, 0.0 }
 0x599   :  { %v693_v31 = vpack.c.bf16 %v692_v30, %v691_v29  ;;  %v1726_v30 = vld [vmem:[%s2173_s8 + $0x30] sm:$0xff]  }
 0x59b   :  { %1583 = vmatpush3.bf16.msra.mxu0 %v693_v31  ;;  %v1728_v31 = vld [vmem:[%s2174_s10] sm:$0xff]  }
 0x59c   :  { %1608 = vmatprep.subr.bf16.mxu0 %v1750_v0 }
 0x59e   :  { %1585 = vmatmul.mubr.msk.bf16.vlgmr.msra.gmra.mrb[12].mxu0 %vm57_vm1, %v1826_v2  ;;  %v1712_v2 = vld [vmem:[%s2168_s6 + $0x80] sm:$0xff]  }
 0x59f   :  { %1624 = vmatprep.mubr.msk.bf16.mxu0 %vm1751_vm0, %v1750_v0  ;;  %1609 = vmatpush3.bf16.msra.mxu0 %v1712_v2 }
 0x5a0   :  { %1610 = vmatprep.subr.bf16.mxu0 %v1750_v0 }
 0x5a3   :  { %1611 = vmatpush3.bf16.msra.mxu0 %v1713_v38 }
 0x5a4   :  { %1612 = vmatprep.subr.bf16.mxu0 %v1750_v0 }
 0x5a7   :  { %1613 = vmatpush3.bf16.msra.mxu0 %v1714_v39 }
 0x5a8   :  { %1614 = vmatprep.subr.bf16.mxu0 %v1750_v0 }
 0x5ab   :  { %1615 = vmatpush3.bf16.msra.mxu0 %v1715_v40 }
 0x5ac   :  { %1616 = vmatprep.subr.bf16.mxu0 %v1750_v0 }
 0x5af   :  { %1617 = vmatpush3.bf16.msra.mxu0 %v1716_v41 }
 0x5b0   :  { %1618 = vmatprep.subr.bf16.mxu0 %v1750_v0 }
 0x5b3   :  { %1619 = vmatpush3.bf16.msra.mxu0 %v1717_v42 }
 0x5b4   :  { %1620 = vmatprep.subr.bf16.mxu0 %v1750_v0 }
 0x5b7   :  { %1621 = vmatpush3.bf16.msra.mxu0 %v1718_v43 }
 0x5b8   :  { %1622 = vmatprep.subr.bf16.mxu0 %v1750_v0 }
 0x5bb   :  { %1623 = vmatpush3.bf16.msra.mxu0 %v1719_v44 }
 0x5bc   :  { %1648 = vmatprep.subr.bf16.mxu0 %v1750_v0 }
 0x671   :  { %v728_v33 = vpop.f32.mrb[12].mxu0 }
 0x672   :  { %v1586_v34 = vpop.f32.mrb[13].mxu0 }
 0x673   :  { %v731_v35 = vpop.f32.mrb[14].mxu0  ;;  %v1731_v34 = vld [vmem:[%s2174_s10 + $0x18] sm:$0xff]  }
 0x674   :  { %v735_v36 = vpack.c.bf16 %v731_v35, %v728_v33  ;;  %v1587_v37 = vpop.f32.mrb[15].mxu0  ;;  %v1730_v33 = vld [vmem:[%s2174_s10 + $0x10] sm:$0xff]   ;;  %v1732_v35 = vld [vmem:[%s2174_s10 + $0x20] sm:$0xff]  }
 0x675   :  { %v1385_v37 = vld [vmem:[%s2172_s7 + $0x2] ss:$0 sm:$0xff] }
 0x676   :  { %1605 = vmatmul.mubr.bf16.vlgmr.msra.gmra.mrb[12].mxu1 %v735_v36  ;;  %v1733_v36 = vld [vmem:[%s2174_s10 + $0x28] sm:$0xff]  }
 0x677   :  { %1644 = vmatprep.mubr.msk.bf16.mxu1 %vm1751_vm0, %v1750_v0  ;;  %1629 = vmatpush3.bf16.msra.mxu1 %v1720_v45 }
 0x678   :  { %1630 = vmatprep.subr.bf16.mxu1 %v1750_v0 }
 0x67b   :  { %1631 = vmatpush3.bf16.msra.mxu1 %v1721_v46  ;;  %v1734_v46 = vld [vmem:[%s2174_s10 + $0x30] sm:$0xff]  }
 0x67c   :  { %1632 = vmatprep.subr.bf16.mxu1 %v1750_v0 }
 0x67f   :  { %1633 = vmatpush3.bf16.msra.mxu1 %v1722_v47  ;;  %v1735_v47 = vld [vmem:[%s2174_s10 + $0x38] sm:$0xff]  }
 0x680   :  { %1634 = vmatprep.subr.bf16.mxu1 %v1750_v0 }
 0x683   :  { %1635 = vmatpush3.bf16.msra.mxu1 %v1723_v48  ;;  %v1394_v48 = vld [vmem:[%s2175_s9] ss:$0 sm:$0xff] }
 0x684   :  { %1636 = vmatprep.subr.bf16.mxu1 %v1750_v0 }
 0x687   :  { %1637 = vmatpush3.bf16.msra.mxu1 %v1724_v49 }
 0x688   :  { %1638 = vmatprep.subr.bf16.mxu1 %v1750_v0 }
 0x68b   :  { %1639 = vmatpush3.bf16.msra.mxu1 %v1725_v50 }
 0x68c   :  { %1640 = vmatprep.subr.bf16.mxu1 %v1750_v0 }
 0x68f   :  { %1641 = vmatpush3.bf16.msra.mxu1 %v1726_v30 }
 0x690   :  { %1642 = vmatprep.subr.bf16.mxu1 %v1750_v0 }
 0x749   :  { %v843_v52 = vpop.f32.mrb[12].mxu1 }
 0x74a   :  { %v1606_v53 = vpop.f32.mrb[13].mxu1  ;;  %v844_v56 = vadd.f32 %v1356_v51, %v843_v52 }
 0x74b   :  { %v846_v54 = vpop.f32.mrb[14].mxu1 }
 0x74c   :  { %v847_v57 = vadd.f32 %v1356_v51, %v846_v54  ;;  %v1607_v58 = vpop.f32.mrb[15].mxu1 }
 0x74e   :  { %v850_v59 = vadd.f32 %v847_v57, %v844_v56 }
 0x750   :  { %v851_v60 = vrot.slane %v850_v59, 4 }
 0x752   :  { %v852_v61 = vadd.f32 %v851_v60, %v850_v59 }
 0x754   :  { %v853_v62 = vrot.slane %v852_v61, 2 }
 0x756   :  { %v854_v63 = vadd.f32 %v853_v62, %v852_v61 }
 0x758   :  { %v855_v1 = vrot.slane %v854_v63, 1 }
 0x75a   :  { %v856_v3 = vadd.f32 %v855_v1, %v854_v63 }
 0x75c   :  { %v857_v4 = vmul.f32 0.0625, %v856_v3 }
 0x75e   :  { %v858_v5 = vsub.f32 %v844_v56, %v857_v4  ;;  %v859_v6 = vsub.f32 %v847_v57, %v857_v4 }
 0x760   :  { %v860_v7 = vmul.f32 %v858_v5, %v858_v5  ;;  %v861_v8 = vmul.f32 %v859_v6, %v859_v6 }
 0x762   :  { %v862_v9 = vadd.f32 %v861_v8, %v860_v7 }
 0x764   :  { %v863_v10 = vrot.slane %v862_v9, 4 }
 0x766   :  { %v864_v11 = vadd.f32 %v863_v10, %v862_v9 }
 0x768   :  { %v865_v12 = vrot.slane %v864_v11, 2 }
 0x76a   :  { %v866_v13 = vadd.f32 %v865_v12, %v864_v11 }
 0x76c   :  { %v867_v14 = vrot.slane %v866_v13, 1 }
 0x76e   :  { %v868_v15 = vadd.f32 %v867_v14, %v866_v13 }
 0x770   :  { %v869_v16 = vmul.f32 0.0625, %v868_v15 }
 0x772   :  { %v872_v17 = vadd.f32 1e-05, %v869_v16 }
 0x774   :  { %1740 = vrsqrt.f32 %v872_v17 }
 0x77e   :  { %v1741_v19 = vpop.eup %1740 }
 0x77f   :  { %v874_v20 = vmul.f32 %v1741_v19, %v1365_v18 }
 0x781   :  { %v879_v21 = vrot.slane %v874_v20, %v1908_v55  ;;  %v1727_v55 = vld [vmem:[%s2173_s8 + $0x38] sm:$0xff]  }
 0x782   :  { %1643 = vmatpush3.bf16.msra.mxu1 %v1727_v55 }
 0x783   :  { %v881_v23 = vmul.f32 %v879_v21, %v858_v5  ;;  %v882_v24 = vmul.f32 %v879_v21, %v859_v6 }
 0x785   :  { %v891_v25 = vadd.f32 %v1367_v22, %v881_v23  ;;  %v892_v26 = vadd.f32 %v1367_v22, %v882_v24 }
 0x787   :  { %v893_v27 = vmax.f32 %v891_v25, 0.0  ;;  %v894_v28 = vmax.f32 %v892_v26, 0.0 }
 0x789   :  { %v895_v29 = vpack.c.bf16 %v894_v28, %v893_v27 }
 0x78b   :  { %1625 = vmatmul.mubr.bf16.vlgmr.msra.gmra.mrb[16].mxu0 %v895_v29 }
 0x78c   :  { %1664 = vmatprep.mubr.msk.bf16.mxu0 %vm1751_vm0, %v1750_v0  ;;  %1649 = vmatpush3.bf16.msra.mxu0 %v1728_v31 }
 0x78d   :  { %1650 = vmatprep.subr.bf16.mxu0 %v1750_v0 }
 0x790   :  { %1651 = vmatpush3.bf16.msra.mxu0 %v1729_v32 }
 0x791   :  { %1652 = vmatprep.subr.bf16.mxu0 %v1750_v0 }
 0x794   :  { %1653 = vmatpush3.bf16.msra.mxu0 %v1730_v33 }
 0x795   :  { %1654 = vmatprep.subr.bf16.mxu0 %v1750_v0 }
 0x798   :  { %1655 = vmatpush3.bf16.msra.mxu0 %v1731_v34 }
 0x799   :  { %1656 = vmatprep.subr.bf16.mxu0 %v1750_v0 }
 0x79c   :  { %1657 = vmatpush3.bf16.msra.mxu0 %v1732_v35 }
 0x79d   :  { %1658 = vmatprep.subr.bf16.mxu0 %v1750_v0 }
 0x7a0   :  { %1659 = vmatpush3.bf16.msra.mxu0 %v1733_v36 }
 0x7a1   :  { %1660 = vmatprep.subr.bf16.mxu0 %v1750_v0 }
 0x7a4   :  { %1661 = vmatpush3.bf16.msra.mxu0 %v1734_v46 }
 0x7a5   :  { %1662 = vmatprep.subr.bf16.mxu0 %v1750_v0  ;;  %v1403_v0 = vld [vmem:[%s2176_s11] ss:$0 sm:$0xff] }
 0x7a8   :  { %1663 = vmatpush3.bf16.msra.mxu0 %v1735_v47 }
 0x85e   :  { %v1003_v2 = vpop.f32.mrb[16].mxu0 }
 0x85f   :  { %v1004_v38 = vadd.f32 %v1385_v37, %v1003_v2  ;;  %v1626_v39 = vpop.f32.mrb[17].mxu0 }
 0x860   :  { %v1006_v40 = vpop.f32.mrb[18].mxu0 }
 0x861   :  { %v1007_v41 = vadd.f32 %v1385_v37, %v1006_v40  ;;  %v1627_v42 = vpop.f32.mrb[19].mxu0  ;;  %v1010_v43 = vmax.f32 %v1004_v38, 0.0 }
 0x863   :  { %v1011_v44 = vmax.f32 %v1007_v41, 0.0 }
 0x865   :  { %v1012_v45 = vpack.c.bf16 %v1011_v44, %v1010_v43 }
 0x867   :  { %1645 = vmatmul.mubr.bf16.vlgmr.msra.gmra.mrb[16].mxu1 %v1012_v45 }
 0x93a   :  { %v1118_v49 = vpop.f32.mrb[16].mxu1 }
 0x93b   :  { %v1119_v50 = vadd.f32 %v1394_v48, %v1118_v49  ;;  %v1646_v51 = vpop.f32.mrb[17].mxu1 }
 0x93c   :  { %v1121_v52 = vpop.f32.mrb[18].mxu1 }
 0x93d   :  { %v1122_v53 = vadd.f32 %v1394_v48, %v1121_v52  ;;  %v1647_v54 = vpop.f32.mrb[19].mxu1  ;;  %v1125_v56 = vmax.f32 %v1119_v50, 0.0 }
 0x93f   :  { %v1126_v57 = vmax.f32 %v1122_v53, 0.0 }
 0x941   :  { %v1127_v58 = vpack.c.bf16 %v1126_v57, %v1125_v56 }
 0x943   :  { %1665 = vmatmul.mubr.bf16.vlgmr.msra.gmra.mrb[20].mxu0 %v1127_v58 }
 0xa16   :  { %v1233_v59 = vpop.f32.mrb[20].mxu0 }
 0xa17   :  { %v1234_v60 = vadd.f32 %v1403_v0, %v1233_v59  ;;  %v1666_v61 = vpop.f32.mrb[21].mxu0 }
 0xa18   :  { %v1236_v62 = vpop.f32.mrb[22].mxu0 }
 0xa19   :  { %v1240_v63 = vsub.f32 0.0, %v1234_v60  ;;  %v1237_v1 = vadd.f32 %v1403_v0, %v1236_v62  ;;  %v1667_v3 = vpop.f32.mrb[23].mxu0 }
 0xa1b   :  { %v1242_v4 = vmul.f32 1.442695, %v1240_v63  ;;  %v1241_v5 = vsub.f32 0.0, %v1237_v1 }
 0xa1d   :  { %1742 = vpow2.f32 %v1242_v4  ;;  %v1244_v6 = vmul.f32 1.442695, %v1241_v5 }
 0xa1f   :  { %1744 = vpow2.f32 %v1244_v6 }
 0xa27   :  { %v1743_v7 = vpop.eup %1742 }
 0xa28   :  { %v1246_v8 = vadd.f32 1.0, %v1743_v7 }
 0xa29   :  { %v1745_v9 = vpop.eup %1744 }
 0xa2a   :  { %1746 = vrcp.f32 %v1246_v8  ;;  %v1247_v10 = vadd.f32 1.0, %v1745_v9 }
 0xa2c   :  { %1748 = vrcp.f32 %v1247_v10 }
 0xa34   :  { %v1747_v11 = vpop.eup %1746 }
 0xa35   :  { %v1250_v12 = vmax.f32 %v1747_v11, 0.0 }
 0xa36   :  { %v1749_v13 = vpop.eup %1748 }
 0xa37   :  { %v1252_v14 = vmin.f32 %v1250_v12, 1.0  ;;  %v1251_v15 = vmax.f32 %v1749_v13, 0.0 }
 0xa39   :  { %1254 = vst [vmem:[%s2177_s12] sm:$0xff] %v1252_v14  ;;  %v1253_v16 = vmin.f32 %v1251_v15, 1.0 }
 0xa3b   :  { %1255 = vst [vmem:[%s2177_s12 + $0x8] sm:$0xff] %v1253_v16 }

</bundles_post_ra>
